<compile_context>
chip_gen: v5e
topology: v5e:2x2
jax: 0.10.0
libtpu: 0.0.40
codegen_flags: <defaults>
</compile_context>

<pallas_src>
import jax
import jax.numpy as jnp
from jax.experimental import pallas as pl
from jax.experimental.pallas import tpu as pltpu


def _round_up(x, m):
    return ((x + m - 1) // m) * m


def _pick_feature_tile(desired, dim, align=128):
    """Largest multiple of `align` that is <= desired and divides `dim`."""
    assert dim % align == 0, f"feature dim {dim} must be a multiple of {align}"
    t = max(align, (min(desired, dim) // align) * align)
    while dim % t != 0:
        t -= align
    return t


def _vmem_plan():
    """(vmem_limit_bytes, desired_tm, desired_tn, desired_tk) per generation."""
    cap = None
    try:
        cap = int(pltpu.get_tpu_info().vmem_capacity_bytes)
    except Exception:
        cap = None
    if cap is not None and cap >= 100 * 1024 * 1024:
        # v5e / v6e: 128 MiB physical VMEM -> big tiles, raised scoped limit.
        return 96 * 1024 * 1024, 1024, 1024, 2048
    # v7x (64 MiB VMEM per TensorCore) or unknown: conservative plan.
    return 48 * 1024 * 1024, 512, 512, 1024


# --------------------------------------------------------------------------- #
# Kernels
# --------------------------------------------------------------------------- #
def _residual_linear_single_pass(xk_ref, xr_ref, w_ref, b_ref, o_ref):
    """Full K reduction in one shot: out = x @ W + b + x (no scratch)."""
    acc = jnp.dot(xk_ref[...], w_ref[...], preferred_element_type=jnp.float32)
    out = acc + b_ref[...] + xr_ref[...].astype(jnp.float32)
    o_ref[...] = out.astype(o_ref.dtype)


def _residual_linear_multi_pass(xk_ref, xr_ref, w_ref, b_ref, o_ref, acc_ref):
    """Tiled-K variant: grid = (i, j, k), k innermost (reduction)."""
    k = pl.program_id(2)

    @pl.when(k == 0)
    def _():
        # Fold the bias into the accumulator init (saves one VPU add later).
        acc_ref[...] = jnp.broadcast_to(b_ref[...], acc_ref.shape)

    acc_ref[...] += jnp.dot(xk_ref[...], w_ref[...],
                            preferred_element_type=jnp.float32)

    @pl.when(k == pl.num_programs(2) - 1)
    def _():
        out = acc_ref[...] + xr_ref[...].astype(jnp.float32)
        o_ref[...] = out.astype(o_ref.dtype)


# --------------------------------------------------------------------------- #
# Wrapper
# --------------------------------------------------------------------------- #
def residual_linear(x, w, b, *, use_bf16_mxu=True, tm=None, tn=None, tk=None):
    """out = (x @ w + b) + x   with x: [M, D], w: [D, D], b: [D]."""
    M, D = x.shape
    K, N = w.shape
    assert K == D and N == D, "Residual(Linear) requires a square D->D layer"

    vmem_limit, d_tm, d_tn, d_tk = _vmem_plan()
    tm = d_tm if tm is None else tm
    tn = d_tn if tn is None else tn
    tk = d_tk if tk is None else tk

    # Row tile: 8-aligned, never beyond the (8-aligned) row count.  Ragged M
    # is handled by Pallas's partial edge blocks (masked stores) -- no pad/slice.
    tm_eff = max(8, min(_round_up(tm, 8), _round_up(M, 8)))
    tn_eff = _pick_feature_tile(tn, N)
    tk_eff = _pick_feature_tile(tk, K)

    grid_m = pl.cdiv(M, tm_eff)
    grid_n = N // tn_eff

    # v7x has two TensorCores: guarantee >= 2 "parallel" grid steps.
    if grid_m * grid_n == 1:
        if M > 8:
            tm_eff = max(8, _round_up(max(8, tm_eff // 2), 8))
            grid_m = pl.cdiv(M, tm_eff)
        if grid_m * grid_n == 1 and N >= 256:
            tn_eff = _pick_feature_tile(max(128, tn_eff // 2), N)
            grid_n = N // tn_eff

    # MXU operands (bf16 unless full-f32 precision was requested); the residual
    # stream keeps the original dtype/precision.
    mxu_dtype = jnp.bfloat16 if use_bf16_mxu else x.dtype
    xk = x.astype(mxu_dtype)
    w_in = w.astype(mxu_dtype)
    b2 = b.reshape(1, N).astype(jnp.float32)   # hoisted reshape + cast

    if tk_eff == K:
        # ---- single pass: no k axis, no accumulator, no pl.when -------------
        grid = (grid_m, grid_n)
        kernel = _residual_linear_single_pass
        in_specs = [
            pl.BlockSpec((tm_eff, K), lambda i, j: (i, 0)),        # x (MXU)
            pl.BlockSpec((tm_eff, tn_eff), lambda i, j: (i, j)),   # x (residual)
            pl.BlockSpec((K, tn_eff), lambda i, j: (0, j)),        # W
            pl.BlockSpec((1, tn_eff), lambda i, j: (0, j)),        # bias
        ]
        out_specs = pl.BlockSpec((tm_eff, tn_eff), lambda i, j: (i, j))
        scratch_shapes = ()
        dims = ("parallel", "parallel")
    else:
        # ---- tiled reduction (very large D) ---------------------------------
        grid = (grid_m, grid_n, K // tk_eff)
        kernel = _residual_linear_multi_pass
        in_specs = [
            pl.BlockSpec((tm_eff, tk_eff), lambda i, j, k: (i, k)),
            pl.BlockSpec((tm_eff, tn_eff), lambda i, j, k: (i, j)),
            pl.BlockSpec((tk_eff, tn_eff), lambda i, j, k: (k, j)),
            pl.BlockSpec((1, tn_eff), lambda i, j, k: (0, j)),
        ]
        out_specs = pl.BlockSpec((tm_eff, tn_eff), lambda i, j, k: (i, j))
        scratch_shapes = (pltpu.VMEM((tm_eff, tn_eff), jnp.float32),)
        dims = ("parallel", "parallel", "arbitrary")

    return pl.pallas_call(
        kernel,
        out_shape=jax.ShapeDtypeStruct((M, N), x.dtype),
        grid_spec=pltpu.PrefetchScalarGridSpec(
            num_scalar_prefetch=0,
            grid=grid,
            in_specs=in_specs,
            out_specs=out_specs,
            scratch_shapes=scratch_shapes,
        ),
        compiler_params=pltpu.CompilerParams(
            dimension_semantics=dims,
            vmem_limit_bytes=vmem_limit,
        ),
    )(xk, x, w_in, b2)


# --------------------------------------------------------------------------- #
# Demo / correctness check
# --------------------------------------------------------------------------- #
if __name__ == "__main__":
    key = jax.random.PRNGKey(0)
    k_x, k_w, k_b, k_x2, k_w2, k_b2 = jax.random.split(key, 6)

    # ---- small shape (batch=2, seq=8, hidden=128) ---------------------------
    batch, seq, hidden = 2, 8, 128
    M, D = batch * seq, hidden
    x = jax.random.normal(k_x, (M, D), dtype=jnp.float32)
    w = jax.random.normal(k_w, (D, D), dtype=jnp.float32) * (1.0 / D ** 0.5)
    b = jax.random.normal(k_b, (D,), dtype=jnp.float32) * 0.01

    out = residual_linear(x, w, b)
    jax.block_until_ready(out)
    # Matched-precision reference (bf16 MXU operands, f32 accumulation).
    ref = (jnp.dot(x.astype(jnp.bfloat16), w.astype(jnp.bfloat16),
                   preferred_element_type=jnp.float32) + b + x)
    assert out.shape == ref.shape
    assert jnp.allclose(out, ref, atol=2e-2, rtol=2e-2), "mismatch (small)"

    # ---- larger shape exercising the ragged-M / multi-tile path -------------
    M2, D2 = 272, 1024   # M2 not tile-aligned -> partial edge block path
    x2 = jax.random.normal(k_x2, (M2, D2), dtype=jnp.float32)
    w2 = jax.random.normal(k_w2, (D2, D2), dtype=jnp.float32) * (1.0 / D2 ** 0.5)
    b2 = jax.random.normal(k_b2, (D2,), dtype=jnp.float32) * 0.01

    out2 = residual_linear(x2, w2, b2)
    jax.block_until_ready(out2)
    ref2 = (jnp.dot(x2.astype(jnp.bfloat16), w2.astype(jnp.bfloat16),
                    preferred_element_type=jnp.float32) + b2 + x2)
    assert out2.shape == ref2.shape
    assert jnp.allclose(out2, ref2, atol=2e-2, rtol=2e-2), "mismatch (tiled)"

    # ---- full-precision path sanity check ------------------------------------
    out3 = residual_linear(x, w, b, use_bf16_mxu=False)
    jax.block_until_ready(out3)
    ref3 = (x @ w + b) + x
    assert jnp.allclose(out3, ref3, atol=2e-3, rtol=2e-3), "mismatch (f32)"

    # TODO(synk): Residual is generic over `fn`; only the Linear instantiation
    # is fused here. Other `fn` bodies would need their own fused kernels.
    print("KERNEL_OK")
</pallas_src>

<mosaic_0001>
module attributes {stable_mosaic.version = 11 : i64} {
  func.func @_residual_linear_single_pass(%arg0: i32, %arg1: i32, %arg2: memref<8x128xbf16, #tpu.memory_space<vmem>>, %arg3: memref<8x128xf32, #tpu.memory_space<vmem>>, %arg4: memref<128x128xbf16, #tpu.memory_space<vmem>>, %arg5: memref<1x128xf32, #tpu.memory_space<vmem>>, %arg6: memref<8x128xf32, #tpu.memory_space<vmem>>) attributes {dimension_semantics = [#tpu.dimension_semantics<parallel>, #tpu.dimension_semantics<parallel>], iteration_bounds = array<i64: 2, 1>, scalar_prefetch = 0 : i64, scratch_operands = 0 : i64, tpu.core_type = #tpu.core_type<tc>, window_params = [{transform_indices = @transform_0, window_bounds = array<i64: 8, 128>}, {transform_indices = @transform_1, window_bounds = array<i64: 8, 128>}, {transform_indices = @transform_2, window_bounds = array<i64: 128, 128>}, {transform_indices = @transform_3, window_bounds = array<i64: 1, 128>}, {transform_indices = @transform_4, window_bounds = array<i64: 8, 128>}]} {
    %c0 = arith.constant 0 : index
    %c0_0 = arith.constant 0 : index
    %0 = vector.load %arg2[%c0, %c0_0] : memref<8x128xbf16, #tpu.memory_space<vmem>>, vector<8x128xbf16>
    %c0_1 = arith.constant 0 : index
    %c0_2 = arith.constant 0 : index
    %1 = vector.load %arg4[%c0_1, %c0_2] : memref<128x128xbf16, #tpu.memory_space<vmem>>, vector<128x128xbf16>
    %cst = arith.constant dense<0.000000e+00> : vector<8x128xf32>
    %2 = tpu.matmul %0, %1, %cst {dimension_numbers = #tpu.dot_dimension_numbers<[1], [0], [0], [1], [0, 0, 1, 1], [], []>} : vector<8x128xbf16>, vector<128x128xbf16>, vector<8x128xf32> -> vector<8x128xf32>
    %c0_3 = arith.constant 0 : index
    %c0_4 = arith.constant 0 : index
    %3 = vector.load %arg5[%c0_3, %c0_4] : memref<1x128xf32, #tpu.memory_space<vmem>>, vector<1x128xf32>
    %4 = vector.broadcast %3 : vector<1x128xf32> to vector<8x128xf32>
    %5 = arith.addf %2, %4 : vector<8x128xf32>
    %c0_5 = arith.constant 0 : index
    %c0_6 = arith.constant 0 : index
    %6 = vector.load %arg3[%c0_5, %c0_6] : memref<8x128xf32, #tpu.memory_space<vmem>>, vector<8x128xf32>
    %7 = arith.addf %5, %6 : vector<8x128xf32>
    %c0_7 = arith.constant 0 : index
    %c0_8 = arith.constant 0 : index
    %8 = vector.load %arg6[%c0_7, %c0_8] : memref<8x128xf32, #tpu.memory_space<vmem>>, vector<8x128xf32>
    tpu.vector_store %arg6[%c0_7, %c0_8], %7 {strides = array<i32>} : memref<8x128xf32, #tpu.memory_space<vmem>>, vector<8x128xf32>,
    return
  }
  func.func @transform_0(%arg0: i32, %arg1: i32) -> (i32, i32) {
    %c0_i32 = arith.constant 0 : i32
    %c0_i32_0 = arith.constant 0 : i32
    return %arg0, %c0_i32 : i32, i32
  }
  func.func @transform_1(%arg0: i32, %arg1: i32) -> (i32, i32) {
    %c0_i32 = arith.constant 0 : i32
    return %arg0, %arg1 : i32, i32
  }
  func.func @transform_2(%arg0: i32, %arg1: i32) -> (i32, i32) {
    %c0_i32 = arith.constant 0 : i32
    %c0_i32_0 = arith.constant 0 : i32
    return %c0_i32, %arg1 : i32, i32
  }
  func.func @transform_3(%arg0: i32, %arg1: i32) -> (i32, i32) {
    %c0_i32 = arith.constant 0 : i32
    %c0_i32_0 = arith.constant 0 : i32
    return %c0_i32, %arg1 : i32, i32
  }
  func.func @transform_4(%arg0: i32, %arg1: i32) -> (i32, i32) {
    %c0_i32 = arith.constant 0 : i32
    return %arg0, %arg1 : i32, i32
  }
}

</mosaic_0001>

<bundles_post_ra>
// kernel: tpu_custom_call.1
= control target key start
LH: loop header
LB: loop body
LE: loop exit
PB: predicated region body
PF: predicated region fallthrough
CT: control target
= control target key end

     0   :  { %s1047_s0 = inlined_call_operand.hbm [shape: bf16[16,128], index: 0, kind: input, shape index: {}]   ;;  %s1048_s1 = inlined_call_operand.hbm [shape: f32[16,128], index: 1, kind: input, shape index: {}]   ;;  %s1049_s2 = inlined_call_operand.hbm [shape: bf16[128,128], index: 2, kind: input, shape index: {}]   ;;  %s1050_s3 = inlined_call_operand.vmem [shape: f32[1,128], index: 3, kind: input, shape index: {}]   ;;  %s1051_s4 = inlined_call_operand.hbm [shape: f32[16,128], index: 4, kind: output, shape index: {}]  }
   0x1   :  { %1056 = sst [smem:[#allocation18_spill]] %s1049_s2 }
   0x2   :  { %9 = vsyncpa [#allocation3], 0 }
   0x3   :  { %11 = vsyncpa [#allocation3 + $0x1], 0 }
   0x4   :  { %12 = vsyncpa [#allocation6], 0 }
   0x5   :  { %14 = vsyncpa [#allocation6 + $0x1], 0 }
   0x6   :  { %15 = vsyncpa [#allocation4], 0 }
   0x7   :  { %17 = vsyncpa [#allocation4 + $0x1], 0  ;;  %s886_s15 = smov 0   ;;  %s888_s16 = smov 0  }
   0x8   :  { %s890_s17 = smov 0   ;;  %s892_s18 = smov 0  }
   0x9   :  { %s894_s19 = smov 0   ;;  %s896_s20 = smov 0  }
   0xa LB: > { %1057 = sst [smem:[#allocation13_spill]] %s836_s15  ;;  %s917_s21 = sadd.s32 4294967295, %s856_s20   ;;  %s856_s20 = sphi %s896_s20, %s23_s20   ;;  %s852_s19 = sphi %s894_s19, %s1077_s19   ;;  %s848_s18 = sphi %s892_s18, %s1076_s18   ;;  %s844_s17 = sphi %s890_s17, %s1075_s17   ;;  %s840_s16 = sphi %s888_s16, %s1074_s16   ;;  %s836_s15 = sphi %s886_s15, %s1073_s15  }
   0xb   : > { %1058 = sst [smem:[#allocation14_spill]] %s844_s17  ;;  %p538_p0 = scmp.ge.s32.totalorder %s856_s20, 1 }
   0xc   : > { %p56_p1 = scmp.eq.s32.totalorder %s917_s21, 0  ;;  %p174_p2 = scmp.lt.s32.totalorder %s856_s20, 3 }
   0xd   : > { %s1059_s2 = sld [smem:[#allocation18_spill]]  ;;  %s858_s26 = smov [#allocation7]  }
   0xe   : > { %p925_p3 = pnand %p538_p0, %p174_p2  ;;  %s189_s27 = sshll.u32 %s858_s26, 4  ;;  %s190_s27 = int_to_ptr.vmem [resolvable:$true] %s189_s27 }
   0xf   : > { %p541_p6 = scmp.ge.s32.totalorder %s856_s20, 2  ;;  %s859_s28 = smov 64  }
  0x10   : > { %p605_p4 = pneg %p925_p3  ;;  %s860_s29 = smov 4  }
  0x11   : > { %s537_s30 = sadd.s32 4294967294, %s856_s20   ;;  %s35_s5 = sadd.s32 1, %s852_s19 }
  0x12   : > { %p606_p5 = pnand %p605_p4, %p56_p1  ;;  %s42_s6 = sadd.s32 1, %s844_s17 }
  0x13   : > { %s187_s24 = sshll.u32 %s1059_s2, 4  ;;  %p37_p7 = scmp.ge.s32.totalorder %s35_s5, 2  ;;  %s188_s24 = int_to_ptr.hbm [resolvable:$true] %s187_s24 }
  0x14   : > { %608 = dma.hbm_to_vmem [thread:$0]  (!%p606_p5), %s188_s24, 1024, %s190_s27, [#allocation6], %s859_s28, %s859_s28, %s860_s29  }
  0x15   : > { %p49_p8 = scmp.ne.s32.totalorder %s844_s17, %s840_s16  ;;  %p50_p9 = scmp.eq.s32.totalorder %s856_s20, 0 }
  0x16   : > { %p55_p10 = scmp.ne.s32.totalorder %s840_s16, %s836_s15  ;;  %s1079_s5 = smov (%p37_p7, %s35_s5), 0 }
  0x17   : > { %1061 = sst [smem:[#allocation15_spill]] %s1079_s5  ;;  %p944_p11 = por %p50_p9, %p49_p8 }
  0x18   : > { %p950_p12 = por %p56_p1, %p55_p10  ;;  %s39_s9 = ssub.s32 %s852_s19, %s1079_s5 }
  0x19   : > { %p161_p13 = scmp.eq.s32.totalorder %s917_s21, 1  ;;  %p40_p0 = scmp.eq.s32.totalorder %s39_s9, 0 }
  0x1a   : > { %p167_p2 = scmp.eq.s32.totalorder %s537_s30, 1  ;;  %p621_p5 = scmp.lt.s32.totalorder %s856_s20, 2 }
  0x1b   : > { %p957_p4 = por %p161_p13, %p49_p8  ;;  %s209_s13 = sand.u32 1, %s844_s17  }
  0x1c   : > { %s963_s11 = scalar_select %p40_p0, %s844_s17, %s42_s6  }
  0x1d   : > { %p965_p7 = por %p167_p2, %p55_p10  ;;  %s542_s14 = sshll.u32 %s209_s13, 2 }
  0x1e   : > { %1065 = sst [smem:[#allocation16_spill]] %s963_s11  ;;  %s543_s22 = sshll.u32 %s852_s19, 2 }
  0x1f   : > { %s1066_s12 = scalar_select %p965_p7, 1, 0 }
  0x20   : > { %s217_s26 = scalar_lea.hbm %s1047_s0, %s543_s22  ;;  %s213_s27 = scalar_lea.vmem [#allocation2], %s542_s14 }
  0x21   : > { %1067 = sst [smem:[#allocation17_spill]] %s1066_s12  ;;  %s221_s28 = sshll.u32 %s213_s27, 4  ;;  %s222_s28 = int_to_ptr.vmem [resolvable:$true] %s221_s28 }
  0x22   : > { %s219_s29 = sshll.u32 %s217_s26, 4  ;;  %p610_p8 = pnand %p621_p5, %p944_p11  ;;  %s220_s29 = int_to_ptr.hbm [resolvable:$true] %s219_s29 }
  0x23   : > { %s228_s30 = sand.u32 1, %s856_s20   ;;  %s544_s6 = sshll.u32 %s209_s13, 3 }
  0x24   : > { %s210_s9 = scalar_lea.sflag [#allocation3], %s209_s13  ;;  %s545_s2 = sshll.u32 %s852_s19, 3 }
  0x25   : > { %612 = dma.hbm_to_vmem [thread:$0]  (!%p610_p8), %s220_s29, 64, %s222_s28, %s210_s9  }
  0x26   : > { %s237_s17 = scalar_lea.hbm %s1048_s1, %s545_s2  ;;  %s232_s12 = scalar_lea.vmem [#allocation5], %s544_s6 }
  0x27   : > { %s241_s15 = sshll.u32 %s232_s12, 4  ;;  %s239_s23 = sshll.u32 %s237_s17, 4  ;;  %s242_s15 = int_to_ptr.vmem [resolvable:$true] %s241_s15  ;;  %s240_s23 = int_to_ptr.hbm [resolvable:$true] %s239_s23 }
  0x28   : > { %s229_s14 = scalar_lea.sflag [#allocation6], %s228_s30  ;;  %250 = sbr.rel (%p925_p3) target bundleno = 217 (0xd9), region = 36 }
  0x29   : > { %615 = dma.hbm_to_vmem [thread:$0]  (!%p610_p8), %s240_s23, 128, %s242_s15, %s229_s14  }
  0x2a   : > { %s984_s7 = sand.u32 (!%p925_p3), 1, %s840_s16  }
  0x2b   : > { %s547_s13 = sshll.u32 (!%p925_p3), %s984_s7, 2  ;;  %s253_s22 = scalar_lea.sflag (!%p925_p3), [#allocation3], %s984_s7 }
  0x2c   : > { %s256_s5 = scalar_lea.vmem (!%p925_p3), [#allocation2], %s547_s13 }
  0x2d   : > { %819 = dma.done.wait (%p950_p12), %s253_s22, 64  }
  0x2e   : > { %821 = vsyncadd (%p950_p12), %s253_s22, 4294967232  ;;  %s262_s2 = sand.u32 1, %s917_s21   ;;  %s548_s15 = sshll.u32 %s984_s7, 3 }
  0x2f   : > { %s263_s17 = scalar_lea.sflag [#allocation6], %s262_s2  ;;  %s266_s25 = scalar_lea.vmem [#allocation5], %s548_s15 }
  0x30   : > { %823 = dma.done.wait (%p950_p12), %s263_s17, 128  }
  0x31   : > { %825 = vsyncadd (%p950_p12), %s263_s17, 4294967168 }
  0x32   : > { %827 = dma.done.wait (%p56_p1), [#allocation6], 1024  }
  0x33   : > { %829 = vsyncadd (%p56_p1), [#allocation6], 4294966272  ;;  %v594_v0 = vld [vmem:[#allocation7 + $0x38] sm:$0xff]  ;;  %v593_v1 = vld [vmem:[#allocation7 + $0x30] sm:$0xff]  ;;  %s584_s21 = sshll.u32 %s848_s18, 3  ;;  %s304_s27 = scalar_lea.vmem [#allocation8], %s548_s15 }
  0x34   : > { %377 = vmatpush.bf16.msra.mxu0 %v594_v0  ;;  %v592_v2 = vld [vmem:[#allocation7 + $0x28] sm:$0xff]  ;;  %v591_v3 = vld [vmem:[#allocation7 + $0x20] sm:$0xff]  ;;  %v590_v4 = vld [vmem:[#allocation7 + $0x18] sm:$0xff]  ;;  %s405_s26 = scalar_lea.hbm %s1051_s4, %s584_s21  ;;  %s407_s28 = sshll.u32 %s304_s27, 4  ;;  %s408_s28 = int_to_ptr.vmem [resolvable:$true] %s407_s28 }
  0x35   : > { %v589_v5 = vld [vmem:[#allocation7 + $0x10] sm:$0xff]  ;;  %v588_v6 = vld [vmem:[#allocation7 + $0x8] sm:$0xff]  ;;  %v587_v7 = vld [vmem:[#allocation7] sm:$0xff]  ;;  %s409_s29 = sshll.u32 %s405_s26, 4  ;;  %s394_s18 = scalar_lea.sflag [#allocation4], %s984_s7  ;;  %s410_s29 = int_to_ptr.hbm [resolvable:$true] %s409_s29 }
  0x36   : > { %v308_v8 = vld [vmem:[%s256_s5] sm:$0xf]  ;;  %v390_v11 = vld [vmem:[%s266_s25] sm:$0xff]  ;;  %s780_s30 = sshra.s32 %s410_s29, 4  ;;  %s786_s14 = scalar_lea.hbm %s1051_s4, 16  ;;  %s781_s30 = int_to_ptr.hbm [resolvable:$true] %s780_s30 }
  0x37   : > { %v675_v9 = vld [vmem:[%s1050_s3] ss:$0 sm:$0xff]  ;;  %s782_s6 = scalar_lea.hbm %s781_s30, 8  ;;  %p787_p10 = scmp.lt.s32.totalorder %s781_s30, %s1051_s4 }
  0x38   : > { %378 = vmatpush.bf16.msra.mxu0 %v593_v1  ;;  %p783_p1 = scmp.ne.s32.totalorder %s781_s30, %s782_s6  ;;  %p788_p11 = scmp.lt.s32.totalorder %s786_s14, %s782_s6 }
  0x3a   : > { %p784_p3 = pnand %p783_p1, %p957_p4  ;;  %p789_p12 = por %p788_p11, %p787_p10 }
  0x3c   : > { %379 = vmatpush.bf16.msra.mxu0 %v592_v2  ;;  %p785_p9 = pneg %p784_p3 }
  0x3e   : > { %p790_p13 = pnand %p789_p12, %p785_p9 }
  0x40   : > { %380 = vmatpush.bf16.msra.mxu0 %v591_v3 }
  0x44   : > { %381 = vmatpush.bf16.msra.mxu0 %v590_v4 }
  0x48   : > { %382 = vmatpush.bf16.msra.mxu0 %v589_v5 }
  0x4c   : > { %383 = vmatpush.bf16.msra.mxu0 %v588_v6 }
  0x50   : > { %384 = vmatpush.bf16.msra.mxu0 %v587_v7 }
  0x53   : > { %385 = vmatmul.bf16.vlgmr.msra.gmra.mxu0 %v308_v8 }
  0xd0   : > { %v386_v10 = vpop.f32.mrf.mxu0 }
  0xd1   : > { %v387_v12 = vadd.f32 %v675_v9, %v386_v10 }
  0xd3   : > { %v391_v13 = vadd.f32 %v390_v11, %v387_v12 }
  0xd5   : > { %392 = vst [vmem:[%s304_s27] sm:$0xff] %v391_v13 }
  0xd6   : > { %793 = shalt.err (!%p790_p13)
}
  0xd7   : > { %603 = dma.vmem_to_hbm [thread:$0]  (%p957_p4), %s408_s28, 128, %s410_s29, %s394_s18  }
  0xd8   : > { %v388_v14 = vpop.f32.mrf.mxu0 }
  0xd9 PF: > { %s1068_s7 = sld [smem:[#allocation13_spill]]  ;;  %p617_p0 = pnand %p541_p6, %p965_p7 }
  0xdb   : > { %p618_p2 = pneg %p617_p0 }
  0xdf   : > { %s421_s2 = sand.u32 1, %s1068_s7  }
  0xe0   : > { %s422_s15 = scalar_lea.sflag [#allocation4], %s421_s2 }
  0xe1   : > { %831 = dma.done.wait (%p618_p2), %s422_s15, 128  }
  0xe2   : > { %833 = vsyncadd (%p618_p2), %s422_s15, 4294967168  ;;  %s23_s20 = sadd.s32 1, %s856_s20   ;;  %s1070_s17 = sld [smem:[#allocation14_spill]] }
  0xe3   : > { %p20_p5 = scmp.ge.s32.totalorder %s23_s20, 4   ;;  %s1071_s10 = sld [smem:[#allocation16_spill]] }
  0xe4   : > { %s1072_s25 = sld [smem:[#allocation15_spill]]  ;;  %s1073_s15 = smov %s840_s16 }
  0xe5   : > { %s1076_s18 = smov %s852_s19 }
  0xe6   :  { %22 = sbr.rel (!%p20_p5) target bundleno = 10 (0xa), region = 102 }
  0xe8   : > { %s1074_s16 = smov %s1070_s17 }
  0xe9   : > { %s1075_s17 = smov %s1071_s10 }
  0xea   : > { %s1077_s19 = smov %s1072_s25 }
  0xeb   :  { %428 = vsyncpa [#allocation3], 1 }
  0xec   :  { %430 = vsyncpa [#allocation3 + $0x1], 1 }
  0xed   :  { %431 = vsyncpa [#allocation6], 1 }
  0xee   :  { %433 = vsyncpa [#allocation6 + $0x1], 1 }
  0xef   :  { %434 = vsyncpa [#allocation4], 1 }
  0xf0   :  { %436 = vsyncpa [#allocation4 + $0x1], 1 }

</bundles_post_ra>
